<compile_context>
chip_gen: v6e
topology: v6e:2x2x1
jax: 0.10.0
libtpu: 0.0.40
codegen_flags: <defaults>
</compile_context>

<pallas_src>
import functools

import jax
import jax.numpy as jnp
from jax.experimental import pallas as pl
from jax.experimental.pallas import tpu as pltpu

EPS = 1e-6  # module default

# Streaming tile budget per buffer; ~85% of HBM roofline is reached well below
# this, and small tiles keep more grid steps (pipelining / v7x core balance).
_PER_BUFFER_BYTES = 2 * 1024 * 1024


def _sublane_pack(dtype):
    """Sublane packing factor: 8 (f32), 16 (bf16/f16), 32 (int8/fp8)."""
    return max(8, 32 // jnp.dtype(dtype).itemsize)


def _vmem_budget_bytes():
    """~75% of this generation's VMEM (=> ~48 MiB on v7x, ~96 MiB on v5e/v6e)."""
    try:
        cap = getattr(pltpu.get_tpu_info(), "vmem_capacity_bytes", None)
        if cap:
            return int(0.75 * cap)
    except Exception:
        pass
    return 48 << 20  # conservative default (v7x-sized)


def _choose_batch_tile(batch, row_bytes, per_buffer, pack, target_steps=8):
    """Largest legal batch tile that still yields >= target_steps grid steps.

    Legal = divides batch, is a multiple of the dtype sublane pack (or == batch),
    and fits the per-buffer VMEM budget.  Returns None if no legal tile exists
    (caller falls back to the two-phase L-chunked path).
    """
    cands = [tb for tb in range(1, batch + 1)
             if batch % tb == 0
             and (tb == batch or tb % pack == 0)
             and tb * row_bytes <= per_buffer]
    if not cands:
        return None
    good = [tb for tb in cands if batch // tb >= target_steps]
    if good:
        return max(good)          # amortize per-step overhead, keep >= 8 steps
    return min(cands)             # small B: maximize step count for pipelining


def _choose_l_tile(L, tb, D, itemsize, per_buffer):
    """L chunk: multiple of 8 (or == L), preferring >=4 steps within budget."""
    cands = [tl for tl in range(1, L + 1)
             if L % tl == 0 and (tl == L or tl % 8 == 0)]
    fitting = [tl for tl in cands if tb * tl * D * itemsize <= per_buffer]
    fitting4 = [tl for tl in fitting if L // tl >= 4]
    if fitting4:
        return max(fitting4)
    if fitting:
        return max(fitting)
    return min(cands)


def _choose_two_phase_batch_tile(B, pack):
    cands = [d for d in range(1, B + 1)
             if B % d == 0 and (d == B or d % pack == 0)]
    return min(cands)


# ----------------------------------------------------------------------------
# Fast path: one fused HBM sweep per (tb, L*D) slab.
# ----------------------------------------------------------------------------
def _fused_kernel(x_ref, o_ref, *, eps, inv_n):
    # View (tb, N).  All stats and the normalize are done in f32 (VALU has
    # large slack on a memory-bound kernel); two-pass centered variance
    # matches the reference exactly.
    xf = x_ref[...].astype(jnp.float32)
    mean = jnp.sum(xf, axis=1, keepdims=True) * inv_n
    d = xf - mean
    var = jnp.sum(d * d, axis=1, keepdims=True) * inv_n
    o_ref[...] = (d * jax.lax.rsqrt(var + eps)).astype(o_ref.dtype)


def _fused_path(x, eps, tb, budget):
    B, L, D = x.shape
    N = L * D
    itemsize = jnp.dtype(x.dtype).itemsize
    x2 = x.reshape(B, N)  # lane-dense 2-D slab; unmasked full-row stores

    tile_bytes = tb * N * itemsize
    # 2x double-buffered in + out, plus the in-kernel f32 temporaries.
    vmem_need = 4 * tile_bytes + 4 * tb * N * 4 + (2 << 20)
    vmem_limit = int(min(max(vmem_need, 8 << 20), budget))

    kernel = functools.partial(_fused_kernel, eps=eps, inv_n=1.0 / N)
    out = pl.pallas_call(
        kernel,
        out_shape=jax.ShapeDtypeStruct((B, N), x.dtype),
        grid_spec=pltpu.PrefetchScalarGridSpec(
            num_scalar_prefetch=0,
            grid=(B // tb,),
            in_specs=[pl.BlockSpec((tb, N), lambda i: (i, 0))],
            out_specs=pl.BlockSpec((tb, N), lambda i: (i, 0)),
        ),
        compiler_params=pltpu.CompilerParams(
            dimension_semantics=("parallel",),
            vmem_limit_bytes=vmem_limit,
        ),
        cost_estimate=pl.CostEstimate(
            flops=int(7 * B * N),
            transcendentals=int(B),
            bytes_accessed=int(2 * B * N * itemsize),
        ),
    )(x2)
    return out.reshape(B, L, D)


# ----------------------------------------------------------------------------
# Big-plane path: two-phase, L-chunked (for rows that exceed the tile budget).
# ----------------------------------------------------------------------------
def _stats_kernel(x_ref, mean_ref, rstd_ref, sum_sc, sq_sc, *, eps, inv_n):
    l = pl.program_id(1)

    @pl.when(l == 0)
    def _():
        sum_sc[...] = jnp.zeros_like(sum_sc)
        sq_sc[...] = jnp.zeros_like(sq_sc)

    xf = x_ref[...].astype(jnp.float32)          # (tb, tl, D)
    sum_sc[...] += jnp.sum(xf, axis=(1, 2))[:, None]
    sq_sc[...] += jnp.sum(xf * xf, axis=(1, 2))[:, None]

    @pl.when(l == pl.num_programs(1) - 1)
    def _():
        # Single-pass E[x^2]-mean^2 here (avoids a third HBM sweep); f32
        # accumulation keeps the cancellation error well within bf16/f32
        # output tolerance for the plane sizes this path targets.
        mean = sum_sc[...] * inv_n
        var = jnp.maximum(sq_sc[...] * inv_n - mean * mean, 0.0)
        mean_ref[...] = mean
        rstd_ref[...] = jax.lax.rsqrt(var + eps)


def _normalize_kernel(x_ref, mean_ref, rstd_ref, o_ref):
    xf = x_ref[...].astype(jnp.float32)          # (tb, tl, D)
    mean = mean_ref[...][:, :, None]             # (tb, 1, 1)
    rstd = rstd_ref[...][:, :, None]
    o_ref[...] = ((xf - mean) * rstd).astype(o_ref.dtype)


def _two_phase_path(x, eps, per_buffer, budget, pack):
    B, L, D = x.shape
    N = L * D
    itemsize = jnp.dtype(x.dtype).itemsize

    tb = _choose_two_phase_batch_tile(B, pack)
    tl = _choose_l_tile(L, tb, D, itemsize, per_buffer)
    # TODO(synk): if even one (tb, tl, D) chunk exceeds the VMEM budget (L has
    # no chunkable divisor and D is huge), also tile D with a 128-multiple.

    chunk_bytes = tb * tl * D * itemsize
    vmem_need = 4 * chunk_bytes + 4 * tb * tl * D * 4 + (2 << 20)
    vmem_limit = int(min(max(vmem_need, 8 << 20), budget))
    gb, gl = B // tb, L // tl

    stats_kernel = functools.partial(_stats_kernel, eps=eps, inv_n=1.0 / N)
    mean, rstd = pl.pallas_call(
        stats_kernel,
        out_shape=(jax.ShapeDtypeStruct((B, 1), jnp.float32),
                   jax.ShapeDtypeStruct((B, 1), jnp.float32)),
        grid_spec=pltpu.PrefetchScalarGridSpec(
            num_scalar_prefetch=0,
            grid=(gb, gl),
            in_specs=[pl.BlockSpec((tb, tl, D), lambda i, l: (i, l, 0))],
            out_specs=(pl.BlockSpec((tb, 1), lambda i, l: (i, 0)),
                       pl.BlockSpec((tb, 1), lambda i, l: (i, 0))),
            scratch_shapes=[pltpu.VMEM((tb, 1), jnp.float32),
                            pltpu.VMEM((tb, 1), jnp.float32)],
        ),
        compiler_params=pltpu.CompilerParams(
            dimension_semantics=("parallel", "arbitrary"),
            vmem_limit_bytes=vmem_limit,
        ),
        cost_estimate=pl.CostEstimate(
            flops=int(3 * B * N),
            transcendentals=int(B),
            bytes_accessed=int(B * N * itemsize + 8 * B),
        ),
    )(x)

    out = pl.pallas_call(
        _normalize_kernel,
        out_shape=jax.ShapeDtypeStruct((B, L, D), x.dtype),
        grid_spec=pltpu.PrefetchScalarGridSpec(
            num_scalar_prefetch=0,
            grid=(gb, gl),
            in_specs=[pl.BlockSpec((tb, tl, D), lambda i, l: (i, l, 0)),
                      pl.BlockSpec((tb, 1), lambda i, l: (i, 0)),
                      pl.BlockSpec((tb, 1), lambda i, l: (i, 0))],
            out_specs=pl.BlockSpec((tb, tl, D), lambda i, l: (i, l, 0)),
        ),
        compiler_params=pltpu.CompilerParams(
            dimension_semantics=("parallel", "parallel"),
            vmem_limit_bytes=vmem_limit,
        ),
        cost_estimate=pl.CostEstimate(
            flops=int(2 * B * N),
            transcendentals=0,
            bytes_accessed=int(2 * B * N * itemsize + 8 * B),
        ),
    )(x, mean, rstd)
    return out


# ----------------------------------------------------------------------------
# Public wrapper
# ----------------------------------------------------------------------------
def my_layer_norm(x, eps=EPS, *, max_buffer_bytes=None):
    """Pallas TPU implementation of MyLayerNorm.forward (no affine params)."""
    B, L, D = x.shape
    N = L * D
    itemsize = jnp.dtype(x.dtype).itemsize
    pack = _sublane_pack(x.dtype)

    budget = _vmem_budget_bytes()
    per_buffer = (max_buffer_bytes if max_buffer_bytes is not None
                  else min(_PER_BUFFER_BYTES, budget // 8))
    row_bytes = N * itemsize

    if row_bytes <= per_buffer:
        tb = _choose_batch_tile(B, row_bytes, per_buffer, pack)
        if tb is not None:
            return _fused_path(x, eps, tb, budget)
    return _two_phase_path(x, eps, per_buffer, budget, pack)


def _reference(x, eps=EPS):
    x32 = x.astype(jnp.float32)
    mean = x32.mean(axis=(1, 2), keepdims=True)
    var = ((x32 - mean) ** 2).mean(axis=(1, 2), keepdims=True)
    return ((x32 - mean) / jnp.sqrt(var + eps)).astype(x.dtype)


if __name__ == "__main__":
    key = jax.random.PRNGKey(0)

    # Small 3-D [batch, seq, hidden] input — fused single-sweep path.
    B, L, D = 2, 8, 32
    x = jax.random.normal(key, (B, L, D), dtype=jnp.float32) * 2.0 + 0.5
    out = jax.block_until_ready(my_layer_norm(x))
    ref = _reference(x)
    assert out.shape == x.shape and out.dtype == x.dtype
    assert jnp.allclose(out, ref, atol=2e-5, rtol=2e-5), \
        float(jnp.max(jnp.abs(out - ref)))

    # Exercise the two-phase (L-chunked) big-plane path by forcing a tiny
    # per-buffer budget; still a small, fast shape.
    B2, L2, D2 = 2, 16, 128
    x2 = jax.random.normal(jax.random.PRNGKey(0), (B2, L2, D2),
                           dtype=jnp.float32) * 2.0 + 0.5
    out2 = jax.block_until_ready(my_layer_norm(x2, max_buffer_bytes=4096))
    ref2 = _reference(x2)
    assert out2.shape == x2.shape and out2.dtype == x2.dtype
    assert jnp.allclose(out2, ref2, atol=1e-4, rtol=1e-4), \
        float(jnp.max(jnp.abs(out2 - ref2)))

    print("KERNEL_OK")
</pallas_src>

<mosaic_0001>
module attributes {stable_mosaic.version = 11 : i64} {
  func.func @_fused_kernel(%arg0: i32, %arg1: memref<2x256xf32, #tpu.memory_space<vmem>>, %arg2: memref<2x256xf32, #tpu.memory_space<vmem>>) attributes {dimension_semantics = [#tpu.dimension_semantics<parallel>], iteration_bounds = array<i64: 1>, scalar_prefetch = 0 : i64, scratch_operands = 0 : i64, tpu.core_type = #tpu.core_type<tc>, window_params = [{transform_indices = @transform_0, window_bounds = array<i64: 2, 256>}, {transform_indices = @transform_1, window_bounds = array<i64: 2, 256>}]} {
    %c0 = arith.constant 0 : index
    %c0_0 = arith.constant 0 : index
    %0 = vector.load %arg1[%c0, %c0_0] : memref<2x256xf32, #tpu.memory_space<vmem>>, vector<2x256xf32>
    %cst = arith.constant dense<0.000000e+00> : vector<2xf32>
    %1 = vector.multi_reduction <add>, %0, %cst [1] : vector<2x256xf32> to vector<2xf32>
    %2 = vector.shape_cast %1 : vector<2xf32> to vector<2x1xf32>
    %cst_1 = arith.constant 3.906250e-03 : f32
    %3 = vector.broadcast %cst_1 : f32 to vector<2x1xf32>
    %4 = arith.mulf %2, %3 : vector<2x1xf32>
    %5 = vector.broadcast %4 : vector<2x1xf32> to vector<2x256xf32>
    %6 = arith.subf %0, %5 : vector<2x256xf32>
    %7 = arith.mulf %6, %6 : vector<2x256xf32>
    %cst_2 = arith.constant dense<0.000000e+00> : vector<2xf32>
    %8 = vector.multi_reduction <add>, %7, %cst_2 [1] : vector<2x256xf32> to vector<2xf32>
    %9 = vector.shape_cast %8 : vector<2xf32> to vector<2x1xf32>
    %cst_3 = arith.constant 3.906250e-03 : f32
    %10 = vector.broadcast %cst_3 : f32 to vector<2x1xf32>
    %11 = arith.mulf %9, %10 : vector<2x1xf32>
    %cst_4 = arith.constant 9.99999997E-7 : f32
    %12 = vector.broadcast %cst_4 : f32 to vector<2x1xf32>
    %13 = arith.addf %11, %12 : vector<2x1xf32>
    %14 = math.rsqrt %13 : vector<2x1xf32>
    %15 = vector.broadcast %14 : vector<2x1xf32> to vector<2x256xf32>
    %16 = arith.mulf %6, %15 : vector<2x256xf32>
    %c0_5 = arith.constant 0 : index
    %c0_6 = arith.constant 0 : index
    %17 = vector.load %arg2[%c0_5, %c0_6] : memref<2x256xf32, #tpu.memory_space<vmem>>, vector<2x256xf32>
    tpu.vector_store %arg2[%c0_5, %c0_6], %16 {strides = array<i32>} : memref<2x256xf32, #tpu.memory_space<vmem>>, vector<2x256xf32>,
    return
  }
  func.func @transform_0(%arg0: i32) -> (i32, i32) {
    %c0_i32 = arith.constant 0 : i32
    %c0_i32_0 = arith.constant 0 : i32
    return %arg0, %c0_i32 : i32, i32
  }
  func.func @transform_1(%arg0: i32) -> (i32, i32) {
    %c0_i32 = arith.constant 0 : i32
    %c0_i32_0 = arith.constant 0 : i32
    return %arg0, %c0_i32 : i32, i32
  }
}

</mosaic_0001>

<bundles_post_ra>
// kernel: tpu_custom_call.1
= control target key start
LH: loop header
LB: loop body
LE: loop exit
PB: predicated region body
PF: predicated region fallthrough
CT: control target
= control target key end

     0   :  { %6 = vsyncpa [#allocation3], 0  ;;  %s170_s0 = inlined_call_operand.hbm [shape: f32[2,256], index: 0, kind: input, shape index: {}]   ;;  %s171_s1 = inlined_call_operand.hbm [shape: f32[2,256], index: 1, kind: output, shape index: {}]  }
   0x1   :  { %7 = vsyncpa [#allocation4], 0  ;;  %s146_s6 = smov [#allocation2]  }
   0x2   :  { %s14_s7 = sshll.u32 %s146_s6, 4  ;;  %s15_s7 = int_to_ptr.vmem [resolvable:$true] %s14_s7 }
   0x3   :  { %s110_s8 = scalar_lea.vmem %s15_s7, 64  ;;  %p115_p1 = scmp.lt.s32.totalorder %s15_s7, %s15_s7 }
   0x4   :  { %p111_p0 = scmp.ne.s32.totalorder %s15_s7, %s110_s8  ;;  %p116_p2 = scmp.lt.s32.totalorder %s110_s8, %s110_s8 }
   0x6   :  { %p117_p3 = por %p116_p2, %p115_p1 }
   0x8   :  { %p118_p4 = pnand %p117_p3, %p111_p0 }
   0xa   :  { %121 = shalt.err (!%p118_p4)
}
   0xb   :  { %17 = dma.hbm_to_vmem [thread:$0]  %s170_s0, 64, %s15_s7, [#allocation3]  }
   0xc   :  { %142 = dma.done.wait [#allocation3], 64  }
   0xd   :  { %143 = vsyncadd [#allocation3], 4294967232  ;;  %v26_v0 = vlaneseq  ;;  %v147_v1 = vmov 1983009808   ;;  %v21_v6 = vld [vmem:[#allocation2] sm:$0xf] }
   0xe   :  { %v24_v2 = vunpack.c.l.s4 %v147_v1  ;;  %vm33_vm0 = vcmask 1041408   ;;  %v148_v12 = vmov 269488144   ;;  %s149_s0 = smov [#allocation5]  }
   0xf   :  { %v27_v3 = vshrl.u32 %v26_v0, 7  ;;  %v42_v13 = vunpack.c.l.s4 %v148_v12  ;;  %s87_s11 = sshll.u32 %s149_s0, 4  ;;  %s88_s11 = int_to_ptr.vmem [resolvable:$true] %s87_s11 }
  0x10   :  { %v25_v4 = vunpack.c.0.s8 %v24_v2  ;;  %s122_s12 = scalar_lea.vmem %s88_s11, 64  ;;  %p127_p6 = scmp.lt.s32.totalorder %s88_s11, %s88_s11 }
  0x11   :  { %v43_v14 = vunpack.c.0.s8 %v42_v13  ;;  %p123_p5 = scmp.ne.s32.totalorder %s88_s11, %s122_s12  ;;  %p128_p7 = scmp.lt.s32.totalorder %s122_s12, %s122_s12 }
  0x12   :  { %v28_v5 = vsub.s32 %v25_v4, %v27_v3 }
  0x13   :  { %v46_v15 = vsub.s32 %v43_v14, %v27_v3  ;;  %p129_p8 = por %p128_p7, %p127_p6 }
  0x14   :  { %v29_v7 = vrot.slane %v21_v6, %v28_v5 }
  0x15   :  { %p130_p9 = pnand %p129_p8, %p123_p5 }
  0x16   :  { %v30_v8 = vcombine.high %v29_v7, %v29_v7  ;;  %v34_v9 = vsel %vm33_vm0, %v29_v7, 0.0 }
  0x18   :  { %v35_v10 = vsel %vm33_vm0, %v30_v8, 0.0 }
  0x19   :  { %v36_v11 = vadd.f32 %v35_v10, %v34_v9 }
  0x1b   :  { %37 = vadd.xlane.f32.xlu0 %v36_v11 }
  0xa4   :  { %v38_v16 = vpop.xlane.xlu0 %37 }
  0xa5   :  { %v39_v17 = vmul.f32 0.00390625, %v38_v16 }
  0xa7   :  { %v47_v18 = vrot.slane %v39_v17, %v46_v15 }
  0xa9   :  { %v49_v19 = vsub.f32 %v21_v6, %v47_v18 }
  0xab   :  { %v50_v20 = vmul.f32 %v49_v19, %v49_v19 }
  0xad   :  { %v58_v21 = vrot.slane %v50_v20, %v28_v5 }
  0xaf   :  { %v59_v22 = vcombine.high %v58_v21, %v58_v21  ;;  %v62_v23 = vsel %vm33_vm0, %v58_v21, 0.0 }
  0xb1   :  { %v63_v24 = vsel %vm33_vm0, %v59_v22, 0.0 }
  0xb2   :  { %v64_v25 = vadd.f32 %v63_v24, %v62_v23 }
  0xb4   :  { %65 = vadd.xlane.f32.xlu0 %v64_v25 }
 0x13d   :  { %v66_v26 = vpop.xlane.xlu0 %65 }
 0x13e   :  { %v67_v27 = vmul.f32 0.00390625, %v66_v26 }
 0x140   :  { %v68_v28 = vadd.f32 1e-06, %v67_v27 }
 0x142   :  { %100 = vrsqrt.f32 %v68_v28 }
 0x14f   :  { %v101_v29 = vpop.eup %100 }
 0x150   :  { %v77_v30 = vrot.slane %v101_v29, %v46_v15 }
 0x152   :  { %v79_v31 = vmul.f32 %v77_v30, %v49_v19 }
 0x154   :  { %80 = vst [vmem:[#allocation5] sm:$0xf] %v79_v31 }
 0x155   :  { %133 = shalt.err (!%p130_p9)
}
 0x156   :  { %90 = dma.vmem_to_hbm [thread:$0]  %s88_s11, 64, %s171_s1, [#allocation4]  }
 0x157   :  { %144 = dma.done.wait [#allocation4], 64  }
 0x158   :  { %145 = vsyncadd [#allocation4], 4294967232 }
 0x159   :  { %94 = vsyncpa [#allocation3], 1 }
 0x15a   :  { %95 = vsyncpa [#allocation4], 1 }

</bundles_post_ra>
